<compile_context>
chip_gen: v6e
topology: v6e:2x2x1
jax: 0.10.0
libtpu: 0.0.40
codegen_flags: <defaults>
</compile_context>

<pallas_src>
import functools

import jax
import jax.numpy as jnp
from jax.experimental import pallas as pl
from jax.experimental.pallas import tpu as pltpu

LANES = 128
LOG_CLAMP = -100.0                 # PyTorch BCE clamps log terms at -100
_TARGET_BLOCK_BYTES = 1 << 20      # ~1 MiB per input per grid step
_VMEM_LIMIT_BYTES = 32 * 1024 * 1024  # safe on v5e/v6e/v7x scoped VMEM


def _bce_elementwise(x, t):
    """Clamped-log BCE, identical semantics to F.binary_cross_entropy."""
    log_x = jnp.maximum(jnp.log(x), LOG_CLAMP)
    log_1mx = jnp.maximum(jnp.log(1.0 - x), LOG_CLAMP)
    return -(t * log_x + (1.0 - t) * log_1mx)


def _bce_partial_kernel(x_ref, t_ref, o_ref, *, block_rows, total_rows, needs_mask):
    """One grid step: BCE over a (block_rows, 128) tile -> (1, 128) partial sum."""
    x = x_ref[...].astype(jnp.float32)
    t = t_ref[...].astype(jnp.float32)
    bce = _bce_elementwise(x, t)
    if needs_mask:
        # Last block may extend past the array; zero out the garbage rows.
        row0 = pl.program_id(0) * block_rows
        row_idx = row0 + jax.lax.broadcasted_iota(jnp.int32, bce.shape, 0)
        bce = jnp.where(row_idx < total_rows, bce, 0.0)
    # Sublane-axis reduce only; the single cross-lane reduce happens once,
    # outside the kernel, on the tiny (nblocks, 128) partials array.
    o_ref[...] = jnp.sum(bce, axis=0, keepdims=True)


def _bce_none_kernel(x_ref, t_ref, o_ref, *, loss_weight):
    x = x_ref[...].astype(jnp.float32)
    t = t_ref[...].astype(jnp.float32)
    o_ref[...] = (loss_weight * _bce_elementwise(x, t)).astype(o_ref.dtype)


def _flatten_lane_dense(a):
    """Row-major flatten to (rows, 128); pads (with 1.0) only if numel % 128 != 0."""
    n = int(a.size)
    flat = a.reshape(-1)
    pad = (-n) % LANES
    if pad:
        # Rare ragged case: small pad, (x=1, t=1) gives an exactly-zero BCE term.
        flat = jnp.concatenate([flat, jnp.ones((pad,), flat.dtype)])
    return flat.reshape(-1, LANES)


def _pick_block_rows(rows, itemsize):
    """Largest row-block that targets ~1 MiB per input per grid step."""
    target = max(8, _TARGET_BLOCK_BYTES // (LANES * max(1, itemsize)))
    if rows <= target:
        return rows               # single full-array block (always legal)
    return int(target)            # 2048 (f32) / 4096 (bf16) — multiple of 8/16


def bce_loss(inputs, targets, reduction="mean", loss_weight=1.0, block_rows=None):
    """Matches BCELoss.forward: loss_weight * F.binary_cross_entropy(...)."""
    n = int(inputs.size)

    # Empty-input corner cases (plain-JAX glue, matches the PyTorch wrapper).
    if n == 0:
        if reduction == "mean":
            return jnp.sum(inputs) * 0.0
        if reduction == "sum":
            return jnp.zeros((), inputs.dtype)
        if reduction == "none":
            return jnp.zeros(inputs.shape, inputs.dtype)
        raise ValueError(f"unsupported reduction: {reduction}")

    x2 = _flatten_lane_dense(inputs)
    t2 = _flatten_lane_dense(targets)
    rows = x2.shape[0]

    if block_rows is None:
        block_rows = _pick_block_rows(rows, jnp.dtype(inputs.dtype).itemsize)
    block_rows = min(int(block_rows), rows)
    nblocks = pl.cdiv(rows, block_rows)

    if reduction in ("mean", "sum"):
        kern = functools.partial(
            _bce_partial_kernel,
            block_rows=block_rows,
            total_rows=rows,
            needs_mask=(rows % block_rows != 0),
        )
        partials = pl.pallas_call(
            kern,
            out_shape=jax.ShapeDtypeStruct((nblocks, LANES), jnp.float32),
            grid_spec=pl.GridSpec(
                grid=(nblocks,),
                in_specs=[
                    pl.BlockSpec((block_rows, LANES), lambda i: (i, 0)),
                    pl.BlockSpec((block_rows, LANES), lambda i: (i, 0)),
                ],
                out_specs=pl.BlockSpec((1, LANES), lambda i: (i, 0)),
            ),
            compiler_params=pltpu.CompilerParams(
                dimension_semantics=("parallel",),
                vmem_limit_bytes=_VMEM_LIMIT_BYTES,
            ),
        )(x2, t2)
        total = jnp.sum(partials, dtype=jnp.float32)
        if reduction == "mean":
            total = total / jnp.float32(n)
        return (jnp.float32(loss_weight) * total).astype(inputs.dtype)

    elif reduction == "none":
        kern = functools.partial(_bce_none_kernel, loss_weight=float(loss_weight))
        out = pl.pallas_call(
            kern,
            out_shape=jax.ShapeDtypeStruct((rows, LANES), inputs.dtype),
            grid_spec=pl.GridSpec(
                grid=(nblocks,),
                in_specs=[
                    pl.BlockSpec((block_rows, LANES), lambda i: (i, 0)),
                    pl.BlockSpec((block_rows, LANES), lambda i: (i, 0)),
                ],
                out_specs=pl.BlockSpec((block_rows, LANES), lambda i: (i, 0)),
            ),
            compiler_params=pltpu.CompilerParams(
                dimension_semantics=("parallel",),
                vmem_limit_bytes=_VMEM_LIMIT_BYTES,
            ),
        )(x2, t2)
        return out.reshape(-1)[:n].reshape(inputs.shape)

    else:
        raise ValueError(f"unsupported reduction: {reduction}")


if __name__ == "__main__":
    key = jax.random.PRNGKey(0)
    k1, k2, k3, k4 = jax.random.split(key, 4)

    def ref_bce(x, t, reduction, loss_weight=1.0):
        xf = x.astype(jnp.float32)
        tf = t.astype(jnp.float32)
        e = -(tf * jnp.maximum(jnp.log(xf), -100.0)
              + (1.0 - tf) * jnp.maximum(jnp.log(1.0 - xf), -100.0))
        if reduction == "mean":
            return loss_weight * jnp.mean(e)
        if reduction == "sum":
            return loss_weight * jnp.sum(e)
        return loss_weight * e

    # Primary NCHW case implied by the module: (N=2, C=4, H=16, W=16).
    shape = (2, 4, 16, 16)
    x = jax.nn.sigmoid(jax.random.normal(k1, shape, jnp.float32))
    t = (jax.random.uniform(k2, shape) > 0.5).astype(jnp.float32)

    loss = jax.block_until_ready(bce_loss(x, t, reduction="mean", loss_weight=1.0))
    assert jnp.allclose(loss, ref_bce(x, t, "mean"), rtol=1e-5, atol=1e-5), loss

    s = jax.block_until_ready(bce_loss(x, t, reduction="sum", loss_weight=0.5))
    assert jnp.allclose(s, ref_bce(x, t, "sum", 0.5), rtol=1e-5, atol=1e-3), s

    e = jax.block_until_ready(bce_loss(x, t, reduction="none", loss_weight=2.0))
    assert e.shape == shape
    assert jnp.allclose(e, ref_bce(x, t, "none", 2.0), rtol=1e-5, atol=1e-5)

    # Ragged case (numel % 128 != 0) with a forced tiny block to exercise the
    # multi-block grid + in-kernel tail row mask on a small input.
    shape2 = (3, 5, 7, 11)  # 1155 elements -> 10 lane rows, block_rows=8 -> 2 blocks
    x2 = jax.nn.sigmoid(jax.random.normal(k3, shape2, jnp.float32))
    t2 = (jax.random.uniform(k4, shape2) > 0.5).astype(jnp.float32)

    l2 = jax.block_until_ready(bce_loss(x2, t2, reduction="mean", block_rows=8))
    assert jnp.allclose(l2, ref_bce(x2, t2, "mean"), rtol=1e-5, atol=1e-5), l2

    e2 = jax.block_until_ready(bce_loss(x2, t2, reduction="none", block_rows=8))
    assert jnp.allclose(e2, ref_bce(x2, t2, "none"), rtol=1e-5, atol=1e-5)

    print("KERNEL_OK")
</pallas_src>

<mosaic_0001>
module attributes {stable_mosaic.version = 11 : i64} {
  func.func @_bce_partial_kernel(%arg0: i32, %arg1: memref<16x128xf32, #tpu.memory_space<vmem>>, %arg2: memref<16x128xf32, #tpu.memory_space<vmem>>, %arg3: memref<1x128xf32, #tpu.memory_space<vmem>>) attributes {dimension_semantics = [#tpu.dimension_semantics<parallel>], iteration_bounds = array<i64: 1>, scalar_prefetch = 0 : i64, scratch_operands = 0 : i64, tpu.core_type = #tpu.core_type<tc>, window_params = [{transform_indices = @transform_0, window_bounds = array<i64: 16, 128>}, {transform_indices = @transform_1, window_bounds = array<i64: 16, 128>}, {transform_indices = @transform_2, window_bounds = array<i64: 1, 128>}]} {
    %c0 = arith.constant 0 : index
    %c0_0 = arith.constant 0 : index
    %0 = vector.load %arg1[%c0, %c0_0] : memref<16x128xf32, #tpu.memory_space<vmem>>, vector<16x128xf32>
    %c0_1 = arith.constant 0 : index
    %c0_2 = arith.constant 0 : index
    %1 = vector.load %arg2[%c0_1, %c0_2] : memref<16x128xf32, #tpu.memory_space<vmem>>, vector<16x128xf32>
    %2 = math.log %0 : vector<16x128xf32>
    %cst = arith.constant -1.000000e+02 : f32
    %3 = vector.broadcast %cst : f32 to vector<16x128xf32>
    %4 = arith.maximumf %2, %3 : vector<16x128xf32>
    %cst_3 = arith.constant 1.000000e+00 : f32
    %5 = vector.broadcast %cst_3 : f32 to vector<16x128xf32>
    %6 = arith.subf %5, %0 : vector<16x128xf32>
    %7 = math.log %6 : vector<16x128xf32>
    %cst_4 = arith.constant -1.000000e+02 : f32
    %8 = vector.broadcast %cst_4 : f32 to vector<16x128xf32>
    %9 = arith.maximumf %7, %8 : vector<16x128xf32>
    %10 = arith.mulf %1, %4 : vector<16x128xf32>
    %cst_5 = arith.constant 1.000000e+00 : f32
    %11 = vector.broadcast %cst_5 : f32 to vector<16x128xf32>
    %12 = arith.subf %11, %1 : vector<16x128xf32>
    %13 = arith.mulf %12, %9 : vector<16x128xf32>
    %14 = arith.addf %10, %13 : vector<16x128xf32>
    %cst_6 = arith.constant 0.000000e+00 : f32
    %15 = vector.broadcast %cst_6 : f32 to vector<16x128xf32>
    %16 = arith.subf %15, %14 : vector<16x128xf32>
    %cst_7 = arith.constant dense<0.000000e+00> : vector<128xf32>
    %17 = vector.multi_reduction <add>, %16, %cst_7 [0] : vector<16x128xf32> to vector<128xf32>
    %18 = vector.shape_cast %17 : vector<128xf32> to vector<1x128xf32>
    %c0_8 = arith.constant 0 : index
    %c0_9 = arith.constant 0 : index
    %19 = vector.load %arg3[%c0_8, %c0_9] : memref<1x128xf32, #tpu.memory_space<vmem>>, vector<1x128xf32>
    tpu.vector_store %arg3[%c0_8, %c0_9], %18 {strides = array<i32>} : memref<1x128xf32, #tpu.memory_space<vmem>>, vector<1x128xf32>,
    return
  }
  func.func @transform_0(%arg0: i32) -> (i32, i32) {
    %c0_i32 = arith.constant 0 : i32
    %c0_i32_0 = arith.constant 0 : i32
    return %arg0, %c0_i32 : i32, i32
  }
  func.func @transform_1(%arg0: i32) -> (i32, i32) {
    %c0_i32 = arith.constant 0 : i32
    %c0_i32_0 = arith.constant 0 : i32
    return %arg0, %c0_i32 : i32, i32
  }
  func.func @transform_2(%arg0: i32) -> (i32, i32) {
    %c0_i32 = arith.constant 0 : i32
    %c0_i32_0 = arith.constant 0 : i32
    return %arg0, %c0_i32 : i32, i32
  }
}

</mosaic_0001>

<bundles_post_ra>
// kernel: tpu_custom_call.1
= control target key start
LH: loop header
LB: loop body
LE: loop exit
PB: predicated region body
PF: predicated region fallthrough
CT: control target
= control target key end

     0   :  { %7 = vsyncpa [#allocation3], 0  ;;  %s200_s0 = inlined_call_operand.hbm [shape: f32[16,128], index: 0, kind: input, shape index: {}]   ;;  %s201_s1 = inlined_call_operand.hbm [shape: f32[16,128], index: 1, kind: input, shape index: {}]   ;;  %s202_s2 = inlined_call_operand.hbm [shape: f32[1,128], index: 2, kind: output, shape index: {}]  }
   0x1   :  { %8 = vsyncpa [#allocation6], 0 }
   0x2   :  { %9 = vsyncpa [#allocation4], 0  ;;  %s171_s9 = smov [#allocation2]  }
   0x3   :  { %s15_s10 = sshll.u32 %s171_s9, 4  ;;  %s16_s10 = int_to_ptr.vmem [resolvable:$true] %s15_s10 }
   0x4   :  { %s113_s11 = scalar_lea.vmem %s16_s10, 256  ;;  %p118_p1 = scmp.lt.s32.totalorder %s16_s10, %s16_s10 }
   0x5   :  { %p114_p0 = scmp.ne.s32.totalorder %s16_s10, %s113_s11  ;;  %p119_p2 = scmp.lt.s32.totalorder %s113_s11, %s113_s11 }
   0x7   :  { %p120_p3 = por %p119_p2, %p118_p1 }
   0x9   :  { %p121_p4 = pnand %p120_p3, %p114_p0 }
   0xb   :  { %124 = shalt.err (!%p121_p4)
}
   0xc   :  { %s172_s12 = smov 128   ;;  %s173_s13 = smov 8  }
   0xd   :  { %21 = dma.hbm_to_vmem [thread:$0]  %s200_s0, 256, %s16_s10, [#allocation3], %s172_s12, %s172_s12, %s173_s13  }
   0xe   :  { %s174_s16 = smov [#allocation5]  }
   0xf   :  { %s27_s17 = sshll.u32 %s174_s16, 4  ;;  %s28_s17 = int_to_ptr.vmem [resolvable:$true] %s27_s17 }
  0x10   :  { %s133_s18 = scalar_lea.vmem %s28_s17, 256  ;;  %p138_p6 = scmp.lt.s32.totalorder %s28_s17, %s28_s17 }
  0x11   :  { %p134_p5 = scmp.ne.s32.totalorder %s28_s17, %s133_s18  ;;  %p139_p7 = scmp.lt.s32.totalorder %s133_s18, %s133_s18 }
  0x13   :  { %p140_p8 = por %p139_p7, %p138_p6 }
  0x15   :  { %p141_p9 = pnand %p140_p8, %p134_p5 }
  0x17   :  { %144 = shalt.err (!%p141_p9)
}
  0x18   :  { %33 = dma.hbm_to_vmem [thread:$0]  %s201_s1, 256, %s28_s17, [#allocation6], %s172_s12, %s172_s12, %s173_s13  }
  0x19   :  { %165 = dma.done.wait [#allocation3], 256  }
  0x1a   :  { %166 = vsyncadd [#allocation3], 4294967040 }
  0x1b   :  { %167 = dma.done.wait [#allocation6], 256  }
  0x1c   :  { %168 = vsyncadd [#allocation6], 4294967040  ;;  %v40_v0 = vld [vmem:[#allocation2] sm:$0xff]  ;;  %v41_v1 = vld [vmem:[#allocation2 + $0x8] sm:$0xff]  ;;  %s175_s0 = smov [#allocation7]  }
  0x1d   :  { %97 = vlog2.f32 %v40_v0  ;;  %v50_v2 = vsub.f32 1.0, %v40_v0  ;;  %v51_v3 = vsub.f32 1.0, %v41_v1  ;;  %v42_v5 = vld [vmem:[#allocation5] sm:$0xff]  ;;  %v43_v7 = vld [vmem:[#allocation5 + $0x8] sm:$0xff]  ;;  %s82_s1 = sshll.u32 %s175_s0, 4  ;;  %s83_s1 = int_to_ptr.vmem [resolvable:$true] %s82_s1 }
  0x1e   :  { %99 = vlog2.f32 %v41_v1  ;;  %v60_v14 = vsub.f32 1.0, %v42_v5  ;;  %v61_v17 = vsub.f32 1.0, %v43_v7  ;;  %s145_s21 = scalar_lea.vmem %s83_s1, 16  ;;  %s149_s22 = scalar_lea.vmem %s83_s1, 32 }
  0x1f   :  { %101 = vlog2.f32 %v50_v2  ;;  %p146_p10 = scmp.ne.s32.totalorder %s83_s1, %s145_s21  ;;  %p150_p11 = scmp.lt.s32.totalorder %s83_s1, %s83_s1 }
  0x20   :  { %103 = vlog2.f32 %v51_v3  ;;  %p151_p12 = scmp.lt.s32.totalorder %s149_s22, %s145_s21 }
  0x22   :  { %p152_p13 = por %p151_p12, %p150_p11 }
  0x24   :  { %p153_p0 = pnand %p152_p13, %p146_p10 }
  0x2a   :  { %v98_v4 = vpop.eup %97 }
  0x2b   :  { %v100_v6 = vpop.eup %99  ;;  %v45_v8 = vmul.f32 0.6931472, %v98_v4 }
  0x2c   :  { %v102_v9 = vpop.eup %101  ;;  %v47_v10 = vmul.f32 0.6931472, %v100_v6 }
  0x2d   :  { %v104_v11 = vpop.eup %103  ;;  %v48_v12 = vmax.f32 %v45_v8, -100.0  ;;  %v53_v13 = vmul.f32 0.6931472, %v102_v9 }
  0x2e   :  { %v49_v15 = vmax.f32 %v47_v10, -100.0  ;;  %v55_v16 = vmul.f32 0.6931472, %v104_v11 }
  0x2f   :  { %v56_v18 = vmax.f32 %v53_v13, -100.0  ;;  %v58_v19 = vmul.f32 %v48_v12, %v42_v5 }
  0x30   :  { %v57_v20 = vmax.f32 %v55_v16, -100.0  ;;  %v59_v21 = vmul.f32 %v49_v15, %v43_v7 }
  0x31   :  { %v62_v22 = vmul.f32 %v60_v14, %v56_v18 }
  0x32   :  { %v63_v23 = vmul.f32 %v61_v17, %v57_v20 }
  0x33   :  { %v64_v24 = vadd.f32 %v62_v22, %v58_v19 }
  0x34   :  { %v65_v25 = vadd.f32 %v63_v23, %v59_v21 }
  0x35   :  { %v66_v26 = vsub.f32 0.0, %v64_v24 }
  0x36   :  { %v67_v27 = vsub.f32 0.0, %v65_v25 }
  0x38   :  { %v68_v28 = vadd.f32 %v67_v27, %v66_v26 }
  0x3a   :  { %v69_v29 = vrot.slane %v68_v28, 4 }
  0x3c   :  { %v70_v30 = vadd.f32 %v69_v29, %v68_v28 }
  0x3e   :  { %v71_v31 = vrot.slane %v70_v30, 2 }
  0x40   :  { %v72_v32 = vadd.f32 %v71_v31, %v70_v30 }
  0x42   :  { %v73_v33 = vrot.slane %v72_v32, 1 }
  0x44   :  { %v74_v34 = vadd.f32 %v73_v33, %v72_v32 }
  0x46   :  { %75 = vst [vmem:[#allocation7] sm:$0x1] %v74_v34 }
  0x47   :  { %156 = shalt.err (!%p153_p0)
}
  0x48   :  { %85 = dma.vmem_to_hbm [thread:$0]  %s83_s1, 16, %s202_s2, [#allocation4]  }
  0x49   :  { %169 = dma.done.wait [#allocation4], 16  }
  0x4a   :  { %170 = vsyncadd [#allocation4], 4294967280 }
  0x4b   :  { %89 = vsyncpa [#allocation3], 1 }
  0x4c   :  { %90 = vsyncpa [#allocation6], 1 }
  0x4d   :  { %91 = vsyncpa [#allocation4], 1 }

</bundles_post_ra>
